<compile_context>
chip_gen: v7x
topology: tpu7x:2x2x1
jax: 0.10.0
libtpu: 0.0.40
codegen_flags: <defaults>
</compile_context>

<pallas_src>
import functools

import numpy as np
import jax
import jax.numpy as jnp
from jax import lax
from jax.experimental import pallas as pl
from jax.experimental.pallas import tpu as pltpu

STATE_DIM = 6
ACTION_DIM = 2
HIDDEN_DIMS = (10, 10)
MAX_ACTION = 1.0
LN_EPS = 1e-5

H1, H2 = HIDDEN_DIMS
MAXF = max(STATE_DIM, H1, H2, ACTION_DIM)   # 10 rows in the packed param buffer

# Column layout of the packed parameter buffer, shape (MAXF, P_COLS).
# Weights are stored transposed ([out, in]) so column k of a weight slab is
# "weights from input feature k to every output" -> ready for broadcast-MAC.
_W1  = 0                       # cols [_W1, _W1+STATE_DIM) : W1^T  (H1, STATE_DIM)
_B1  = _W1 + STATE_DIM
_G1  = _B1 + 1
_BE1 = _G1 + 1
_W2  = _BE1 + 1                # cols [_W2, _W2+H1)        : W2^T  (H2, H1)
_B2  = _W2 + H1
_G2  = _B2 + 1
_BE2 = _G2 + 1
_W3  = _BE2 + 1                # cols [_W3, _W3+H2)        : W3^T  (ACTION_DIM, H2)
_B3  = _W3 + H2
P_COLS = _B3 + 1               # 33


def _matvec_t(wt, x, mac_dtype):
    """(out, kin) x (kin, TB) -> (out, TB) via unrolled VPU broadcast-MACs.

    MACs optionally run in bf16 (v6e/v7x native VPU dtype); result is f32."""
    wt = wt.astype(mac_dtype)
    x = x.astype(mac_dtype)
    kin = wt.shape[1]
    acc = wt[:, 0:1] * x[0:1, :]
    for k in range(1, kin):
        acc = acc + wt[:, k:k + 1] * x[k:k + 1, :]
    return acc.astype(jnp.float32)


def _layernorm_t(h, gamma, beta):
    """LayerNorm over the feature axis (axis 0 in the feature-major layout).

    torch.nn.LayerNorm semantics: biased variance, eps added to var before the
    rsqrt, normalization over exactly the real feature count.  Uses two
    independent reductions and var = E[h^2] - mu^2 (review item), with a
    partially folded epilogue so only one broadcast-sub pass remains."""
    mu = jnp.mean(h, axis=0, keepdims=True)        # (1, TB)  reduction #1
    ms = jnp.mean(h * h, axis=0, keepdims=True)    # (1, TB)  reduction #2 (independent)
    inv = lax.rsqrt(ms - mu * mu + LN_EPS)         # (1, TB)  EUP
    mi = mu * inv                                  # (1, TB)  cheap
    return (h * inv - mi) * gamma + beta           # 4 full-size VPU ops


def actor_kernel(x_ref, p_ref, out_ref, *, mac_dtype):
    x = x_ref[...].astype(jnp.float32)          # (STATE_DIM, TB)  batch on lanes
    p = p_ref[...]                              # (MAXF, P_COLS)   packed parameters

    # Carve the packed buffer with static slices (zero-cost ref/array views).
    w1t = p[:H1, _W1:_W1 + STATE_DIM]           # (H1, STATE_DIM)
    b1  = p[:H1, _B1:_B1 + 1]                   # (H1, 1)
    g1  = p[:H1, _G1:_G1 + 1]
    be1 = p[:H1, _BE1:_BE1 + 1]
    w2t = p[:H2, _W2:_W2 + H1]                  # (H2, H1)
    b2  = p[:H2, _B2:_B2 + 1]
    g2  = p[:H2, _G2:_G2 + 1]
    be2 = p[:H2, _BE2:_BE2 + 1]
    w3t = p[:ACTION_DIM, _W3:_W3 + H2]          # (ACTION_DIM, H2)
    b3  = p[:ACTION_DIM, _B3:_B3 + 1]           # (ACTION_DIM, 1)

    # Layer 1: Linear -> LayerNorm -> ReLU
    h = _matvec_t(w1t, x, mac_dtype) + b1       # (H1, TB)
    h = jnp.maximum(_layernorm_t(h, g1, be1), 0.0)

    # Layer 2: Linear -> LayerNorm -> ReLU
    h = _matvec_t(w2t, h, mac_dtype) + b2       # (H2, TB)
    h = jnp.maximum(_layernorm_t(h, g2, be2), 0.0)

    # Output layer: Linear -> tanh -> * max_action  (lane-dense (2, TB) store)
    y = _matvec_t(w3t, h, mac_dtype) + b3       # (ACTION_DIM, TB)
    out_ref[...] = (MAX_ACTION * jnp.tanh(y)).astype(out_ref.dtype)


def _round_up(x, m):
    return ((x + m - 1) // m) * m


def _pick_tile(batch, block_batch):
    """Pick the batch-tile width (lane axis).

    - single full block only when the batch cannot be split into >= 2
      lane-aligned (multiple-of-128) tiles,
    - otherwise guarantee >= 2 grid steps (v7x megacore sharding) while
      capping at block_batch (pipeline granularity / VMEM)."""
    if batch < 2 * 128:
        return batch
    tb = min(_round_up(block_batch, 128), _round_up((batch + 1) // 2, 128))
    return max(128, tb)


def actor_forward_t(state_t, packed_params, *, block_batch=8192,
                    mac_dtype=jnp.float32):
    """Actor forward, feature-major layout end-to-end.

    state_t: (STATE_DIM, batch)  ->  (ACTION_DIM, batch).
    Use this entry point on the hot path (no transposes anywhere)."""
    state_t = state_t.astype(jnp.float32)
    batch = state_t.shape[1]

    tb = _pick_tile(batch, block_batch)
    grid = (pl.cdiv(batch, tb),)

    compiler_kwargs = dict(dimension_semantics=("parallel",))   # v7x megacore
    if tb > 16384:
        # (10, tb) f32 intermediates + double-buffered I/O tiles outgrow the
        # conservative default scoped-VMEM limit around ~32K-lane tiles.
        compiler_kwargs["vmem_limit_bytes"] = 48 * 1024 * 1024

    return pl.pallas_call(
        functools.partial(actor_kernel, mac_dtype=mac_dtype),
        out_shape=jax.ShapeDtypeStruct((ACTION_DIM, batch), jnp.float32),
        grid=grid,
        in_specs=[
            pl.BlockSpec((STATE_DIM, tb), lambda i: (0, i)),    # batch tile
            pl.BlockSpec((MAXF, P_COLS), lambda i: (0, 0)),     # params: one DMA, VMEM-resident
        ],
        out_specs=pl.BlockSpec((ACTION_DIM, tb), lambda i: (0, i)),
        compiler_params=pltpu.CompilerParams(**compiler_kwargs),
    )(state_t, packed_params)


def actor_forward(state, packed_params, **kwargs):
    """Convenience wrapper for natural [batch, feature] callers.

    NOTE: the two transposes below are pure layout plumbing (extra XLA
    dispatches + HBM passes); prefer actor_forward_t and keep the feature-major
    layout in the surrounding code."""
    out_t = actor_forward_t(jnp.transpose(state), packed_params, **kwargs)
    return jnp.transpose(out_t)


def init_params(key):
    """Mirror of the torch module's _init_weights: orthogonal(gain=sqrt(2))
    linear weights, zero biases, LayerNorm weight=1 bias=0.
    Weights are stored as [in, out] (transposed vs. torch's [out, in])."""
    ortho = jax.nn.initializers.orthogonal(scale=np.sqrt(2.0))
    k1, k2, k3 = jax.random.split(key, 3)
    return {
        "w1": ortho(k1, (STATE_DIM, H1), jnp.float32),
        "b1": jnp.zeros((H1,), jnp.float32),
        "g1": jnp.ones((H1,), jnp.float32),
        "be1": jnp.zeros((H1,), jnp.float32),
        "w2": ortho(k2, (H1, H2), jnp.float32),
        "b2": jnp.zeros((H2,), jnp.float32),
        "g2": jnp.ones((H2,), jnp.float32),
        "be2": jnp.zeros((H2,), jnp.float32),
        "w3": ortho(k3, (H2, ACTION_DIM), jnp.float32),
        "b3": jnp.zeros((ACTION_DIM,), jnp.float32),
    }


def pack_params(params):
    """Pack all parameters into one (MAXF, P_COLS) f32 buffer (single DMA)."""
    p = jnp.zeros((MAXF, P_COLS), jnp.float32)
    p = p.at[:H1, _W1:_W1 + STATE_DIM].set(params["w1"].T)
    p = p.at[:H1, _B1].set(params["b1"])
    p = p.at[:H1, _G1].set(params["g1"])
    p = p.at[:H1, _BE1].set(params["be1"])
    p = p.at[:H2, _W2:_W2 + H1].set(params["w2"].T)
    p = p.at[:H2, _B2].set(params["b2"])
    p = p.at[:H2, _G2].set(params["g2"])
    p = p.at[:H2, _BE2].set(params["be2"])
    p = p.at[:ACTION_DIM, _W3:_W3 + H2].set(params["w3"].T)
    p = p.at[:ACTION_DIM, _B3].set(params["b3"])
    return p


def actor_forward_ref(state, params):
    """Pure-JAX reference (natural [batch, feat] layout), torch semantics."""
    def ln(h, g, b):
        mu = jnp.mean(h, axis=-1, keepdims=True)
        var = jnp.mean((h - mu) ** 2, axis=-1, keepdims=True)
        return (h - mu) / jnp.sqrt(var + LN_EPS) * g + b

    h = state @ params["w1"] + params["b1"]
    h = jnp.maximum(ln(h, params["g1"], params["be1"]), 0.0)
    h = h @ params["w2"] + params["b2"]
    h = jnp.maximum(ln(h, params["g2"], params["be2"]), 0.0)
    y = h @ params["w3"] + params["b3"]
    return MAX_ACTION * jnp.tanh(y)


if __name__ == "__main__":
    key = jax.random.PRNGKey(0)
    k_param, k_small, k_large = jax.random.split(key, 3)

    params = init_params(k_param)
    packed = pack_params(params)

    # Case 1: tiny batch, feature-major end-to-end (single full block, grid=(1,)).
    state_t_small = jax.random.normal(k_small, (STATE_DIM, 8), dtype=jnp.float32)
    out_t_small = jax.block_until_ready(actor_forward_t(state_t_small, packed))
    ref_small = actor_forward_ref(state_t_small.T, params)
    np.testing.assert_allclose(np.asarray(out_t_small.T), np.asarray(ref_small),
                               rtol=1e-4, atol=1e-4)
    assert out_t_small.shape == (ACTION_DIM, 8)
    assert bool(jnp.all(jnp.abs(out_t_small) <= MAX_ACTION + 1e-6))

    # Case 2: batch grid with >= 2 "parallel" steps (v7x megacore) and a partial
    # edge block (masked edge-block store drops the garbage padded lanes).
    state_t_large = jax.random.normal(k_large, (STATE_DIM, 300), dtype=jnp.float32)
    out_t_large = jax.block_until_ready(actor_forward_t(state_t_large, packed))
    ref_large = actor_forward_ref(state_t_large.T, params)
    np.testing.assert_allclose(np.asarray(out_t_large.T), np.asarray(ref_large),
                               rtol=1e-4, atol=1e-4)
    assert out_t_large.shape == (ACTION_DIM, 300)

    # Case 3: natural-layout convenience wrapper + opt-in bf16 MAC path
    # (v6e/v7x perf option; loose tolerance is expected for bf16 MACs).
    state_nat = jnp.transpose(state_t_large)
    out_bf16 = jax.block_until_ready(
        actor_forward(state_nat, packed, mac_dtype=jnp.bfloat16))
    np.testing.assert_allclose(np.asarray(out_bf16), np.asarray(ref_large),
                               rtol=1e-1, atol=1e-1)

    print("KERNEL_OK")
</pallas_src>

<mosaic_0001>
module attributes {stable_mosaic.version = 11 : i64} {
  func.func @actor_kernel(%arg0: i32, %arg1: memref<6x8xf32, #tpu.memory_space<vmem>>, %arg2: memref<10x33xf32, #tpu.memory_space<vmem>>, %arg3: memref<2x8xf32, #tpu.memory_space<vmem>>) attributes {dimension_semantics = [#tpu.dimension_semantics<parallel>], iteration_bounds = array<i64: 1>, scalar_prefetch = 0 : i64, scratch_operands = 0 : i64, tpu.core_type = #tpu.core_type<tc>, window_params = [{transform_indices = @transform_0, window_bounds = array<i64: 6, 8>}, {pipeline_mode = #tpu.pipeline_mode<synchronous>, transform_indices = @transform_1, window_bounds = array<i64: 10, 33>}, {transform_indices = @transform_2, window_bounds = array<i64: 2, 8>}]} {
    %c0 = arith.constant 0 : index
    %c0_0 = arith.constant 0 : index
    %0 = vector.load %arg1[%c0, %c0_0] : memref<6x8xf32, #tpu.memory_space<vmem>>, vector<6x8xf32>
    %c0_1 = arith.constant 0 : index
    %c0_2 = arith.constant 0 : index
    %1 = vector.load %arg2[%c0_1, %c0_2] : memref<10x33xf32, #tpu.memory_space<vmem>>, vector<10x33xf32>
    %2 = vector.extract_strided_slice %1 {offsets = [0, 0], sizes = [10, 6], strides = [1, 1]} : vector<10x33xf32> to vector<10x6xf32>
    %3 = vector.extract_strided_slice %1 {offsets = [0, 6], sizes = [10, 1], strides = [1, 1]} : vector<10x33xf32> to vector<10x1xf32>
    %4 = vector.extract_strided_slice %1 {offsets = [0, 7], sizes = [10, 1], strides = [1, 1]} : vector<10x33xf32> to vector<10x1xf32>
    %5 = vector.extract_strided_slice %1 {offsets = [0, 8], sizes = [10, 1], strides = [1, 1]} : vector<10x33xf32> to vector<10x1xf32>
    %6 = vector.extract_strided_slice %1 {offsets = [0, 9], sizes = [10, 10], strides = [1, 1]} : vector<10x33xf32> to vector<10x10xf32>
    %7 = vector.extract_strided_slice %1 {offsets = [0, 19], sizes = [10, 1], strides = [1, 1]} : vector<10x33xf32> to vector<10x1xf32>
    %8 = vector.extract_strided_slice %1 {offsets = [0, 20], sizes = [10, 1], strides = [1, 1]} : vector<10x33xf32> to vector<10x1xf32>
    %9 = vector.extract_strided_slice %1 {offsets = [0, 21], sizes = [10, 1], strides = [1, 1]} : vector<10x33xf32> to vector<10x1xf32>
    %10 = vector.extract_strided_slice %1 {offsets = [0, 22], sizes = [2, 10], strides = [1, 1]} : vector<10x33xf32> to vector<2x10xf32>
    %11 = vector.extract_strided_slice %1 {offsets = [0, 32], sizes = [2, 1], strides = [1, 1]} : vector<10x33xf32> to vector<2x1xf32>
    %12 = vector.extract_strided_slice %2 {offsets = [0, 0], sizes = [10, 1], strides = [1, 1]} : vector<10x6xf32> to vector<10x1xf32>
    %13 = vector.extract_strided_slice %0 {offsets = [0, 0], sizes = [1, 8], strides = [1, 1]} : vector<6x8xf32> to vector<1x8xf32>
    %14 = vector.broadcast %12 : vector<10x1xf32> to vector<10x8xf32>
    %15 = vector.broadcast %13 : vector<1x8xf32> to vector<10x8xf32>
    %16 = arith.mulf %14, %15 : vector<10x8xf32>
    %17 = vector.extract_strided_slice %2 {offsets = [0, 1], sizes = [10, 1], strides = [1, 1]} : vector<10x6xf32> to vector<10x1xf32>
    %18 = vector.extract_strided_slice %0 {offsets = [1, 0], sizes = [1, 8], strides = [1, 1]} : vector<6x8xf32> to vector<1x8xf32>
    %19 = vector.broadcast %17 : vector<10x1xf32> to vector<10x8xf32>
    %20 = vector.broadcast %18 : vector<1x8xf32> to vector<10x8xf32>
    %21 = arith.mulf %19, %20 : vector<10x8xf32>
    %22 = arith.addf %16, %21 : vector<10x8xf32>
    %23 = vector.extract_strided_slice %2 {offsets = [0, 2], sizes = [10, 1], strides = [1, 1]} : vector<10x6xf32> to vector<10x1xf32>
    %24 = vector.extract_strided_slice %0 {offsets = [2, 0], sizes = [1, 8], strides = [1, 1]} : vector<6x8xf32> to vector<1x8xf32>
    %25 = vector.broadcast %23 : vector<10x1xf32> to vector<10x8xf32>
    %26 = vector.broadcast %24 : vector<1x8xf32> to vector<10x8xf32>
    %27 = arith.mulf %25, %26 : vector<10x8xf32>
    %28 = arith.addf %22, %27 : vector<10x8xf32>
    %29 = vector.extract_strided_slice %2 {offsets = [0, 3], sizes = [10, 1], strides = [1, 1]} : vector<10x6xf32> to vector<10x1xf32>
    %30 = vector.extract_strided_slice %0 {offsets = [3, 0], sizes = [1, 8], strides = [1, 1]} : vector<6x8xf32> to vector<1x8xf32>
    %31 = vector.broadcast %29 : vector<10x1xf32> to vector<10x8xf32>
    %32 = vector.broadcast %30 : vector<1x8xf32> to vector<10x8xf32>
    %33 = arith.mulf %31, %32 : vector<10x8xf32>
    %34 = arith.addf %28, %33 : vector<10x8xf32>
    %35 = vector.extract_strided_slice %2 {offsets = [0, 4], sizes = [10, 1], strides = [1, 1]} : vector<10x6xf32> to vector<10x1xf32>
    %36 = vector.extract_strided_slice %0 {offsets = [4, 0], sizes = [1, 8], strides = [1, 1]} : vector<6x8xf32> to vector<1x8xf32>
    %37 = vector.broadcast %35 : vector<10x1xf32> to vector<10x8xf32>
    %38 = vector.broadcast %36 : vector<1x8xf32> to vector<10x8xf32>
    %39 = arith.mulf %37, %38 : vector<10x8xf32>
    %40 = arith.addf %34, %39 : vector<10x8xf32>
    %41 = vector.extract_strided_slice %2 {offsets = [0, 5], sizes = [10, 1], strides = [1, 1]} : vector<10x6xf32> to vector<10x1xf32>
    %42 = vector.extract_strided_slice %0 {offsets = [5, 0], sizes = [1, 8], strides = [1, 1]} : vector<6x8xf32> to vector<1x8xf32>
    %43 = vector.broadcast %41 : vector<10x1xf32> to vector<10x8xf32>
    %44 = vector.broadcast %42 : vector<1x8xf32> to vector<10x8xf32>
    %45 = arith.mulf %43, %44 : vector<10x8xf32>
    %46 = arith.addf %40, %45 : vector<10x8xf32>
    %47 = vector.broadcast %3 : vector<10x1xf32> to vector<10x8xf32>
    %48 = arith.addf %46, %47 : vector<10x8xf32>
    %cst = arith.constant dense<0.000000e+00> : vector<8xf32>
    %49 = vector.multi_reduction <add>, %48, %cst [0] : vector<10x8xf32> to vector<8xf32>
    %50 = vector.shape_cast %49 : vector<8xf32> to vector<1x8xf32>
    %cst_3 = arith.constant 1.000000e+01 : f32
    %51 = vector.broadcast %cst_3 : f32 to vector<1x8xf32>
    %52 = arith.divf %50, %51 : vector<1x8xf32>
    %53 = arith.mulf %48, %48 : vector<10x8xf32>
    %cst_4 = arith.constant dense<0.000000e+00> : vector<8xf32>
    %54 = vector.multi_reduction <add>, %53, %cst_4 [0] : vector<10x8xf32> to vector<8xf32>
    %55 = vector.shape_cast %54 : vector<8xf32> to vector<1x8xf32>
    %cst_5 = arith.constant 1.000000e+01 : f32
    %56 = vector.broadcast %cst_5 : f32 to vector<1x8xf32>
    %57 = arith.divf %55, %56 : vector<1x8xf32>
    %58 = arith.mulf %52, %52 : vector<1x8xf32>
    %59 = arith.subf %57, %58 : vector<1x8xf32>
    %cst_6 = arith.constant 9.99999974E-6 : f32
    %60 = vector.broadcast %cst_6 : f32 to vector<1x8xf32>
    %61 = arith.addf %59, %60 : vector<1x8xf32>
    %62 = math.rsqrt %61 : vector<1x8xf32>
    %63 = arith.mulf %52, %62 : vector<1x8xf32>
    %64 = vector.broadcast %62 : vector<1x8xf32> to vector<10x8xf32>
    %65 = arith.mulf %48, %64 : vector<10x8xf32>
    %66 = vector.broadcast %63 : vector<1x8xf32> to vector<10x8xf32>
    %67 = arith.subf %65, %66 : vector<10x8xf32>
    %68 = vector.broadcast %4 : vector<10x1xf32> to vector<10x8xf32>
    %69 = arith.mulf %67, %68 : vector<10x8xf32>
    %70 = vector.broadcast %5 : vector<10x1xf32> to vector<10x8xf32>
    %71 = arith.addf %69, %70 : vector<10x8xf32>
    %cst_7 = arith.constant 0.000000e+00 : f32
    %72 = vector.broadcast %cst_7 : f32 to vector<10x8xf32>
    %73 = arith.maximumf %71, %72 : vector<10x8xf32>
    %74 = vector.extract_strided_slice %6 {offsets = [0, 0], sizes = [10, 1], strides = [1, 1]} : vector<10x10xf32> to vector<10x1xf32>
    %75 = vector.extract_strided_slice %73 {offsets = [0, 0], sizes = [1, 8], strides = [1, 1]} : vector<10x8xf32> to vector<1x8xf32>
    %76 = vector.broadcast %74 : vector<10x1xf32> to vector<10x8xf32>
    %77 = vector.broadcast %75 : vector<1x8xf32> to vector<10x8xf32>
    %78 = arith.mulf %76, %77 : vector<10x8xf32>
    %79 = vector.extract_strided_slice %6 {offsets = [0, 1], sizes = [10, 1], strides = [1, 1]} : vector<10x10xf32> to vector<10x1xf32>
    %80 = vector.extract_strided_slice %73 {offsets = [1, 0], sizes = [1, 8], strides = [1, 1]} : vector<10x8xf32> to vector<1x8xf32>
    %81 = vector.broadcast %79 : vector<10x1xf32> to vector<10x8xf32>
    %82 = vector.broadcast %80 : vector<1x8xf32> to vector<10x8xf32>
    %83 = arith.mulf %81, %82 : vector<10x8xf32>
    %84 = arith.addf %78, %83 : vector<10x8xf32>
    %85 = vector.extract_strided_slice %6 {offsets = [0, 2], sizes = [10, 1], strides = [1, 1]} : vector<10x10xf32> to vector<10x1xf32>
    %86 = vector.extract_strided_slice %73 {offsets = [2, 0], sizes = [1, 8], strides = [1, 1]} : vector<10x8xf32> to vector<1x8xf32>
    %87 = vector.broadcast %85 : vector<10x1xf32> to vector<10x8xf32>
    %88 = vector.broadcast %86 : vector<1x8xf32> to vector<10x8xf32>
    %89 = arith.mulf %87, %88 : vector<10x8xf32>
    %90 = arith.addf %84, %89 : vector<10x8xf32>
    %91 = vector.extract_strided_slice %6 {offsets = [0, 3], sizes = [10, 1], strides = [1, 1]} : vector<10x10xf32> to vector<10x1xf32>
    %92 = vector.extract_strided_slice %73 {offsets = [3, 0], sizes = [1, 8], strides = [1, 1]} : vector<10x8xf32> to vector<1x8xf32>
    %93 = vector.broadcast %91 : vector<10x1xf32> to vector<10x8xf32>
    %94 = vector.broadcast %92 : vector<1x8xf32> to vector<10x8xf32>
    %95 = arith.mulf %93, %94 : vector<10x8xf32>
    %96 = arith.addf %90, %95 : vector<10x8xf32>
    %97 = vector.extract_strided_slice %6 {offsets = [0, 4], sizes = [10, 1], strides = [1, 1]} : vector<10x10xf32> to vector<10x1xf32>
    %98 = vector.extract_strided_slice %73 {offsets = [4, 0], sizes = [1, 8], strides = [1, 1]} : vector<10x8xf32> to vector<1x8xf32>
    %99 = vector.broadcast %97 : vector<10x1xf32> to vector<10x8xf32>
    %100 = vector.broadcast %98 : vector<1x8xf32> to vector<10x8xf32>
    %101 = arith.mulf %99, %100 : vector<10x8xf32>
    %102 = arith.addf %96, %101 : vector<10x8xf32>
    %103 = vector.extract_strided_slice %6 {offsets = [0, 5], sizes = [10, 1], strides = [1, 1]} : vector<10x10xf32> to vector<10x1xf32>
    %104 = vector.extract_strided_slice %73 {offsets = [5, 0], sizes = [1, 8], strides = [1, 1]} : vector<10x8xf32> to vector<1x8xf32>
    %105 = vector.broadcast %103 : vector<10x1xf32> to vector<10x8xf32>
    %106 = vector.broadcast %104 : vector<1x8xf32> to vector<10x8xf32>
    %107 = arith.mulf %105, %106 : vector<10x8xf32>
    %108 = arith.addf %102, %107 : vector<10x8xf32>
    %109 = vector.extract_strided_slice %6 {offsets = [0, 6], sizes = [10, 1], strides = [1, 1]} : vector<10x10xf32> to vector<10x1xf32>
    %110 = vector.extract_strided_slice %73 {offsets = [6, 0], sizes = [1, 8], strides = [1, 1]} : vector<10x8xf32> to vector<1x8xf32>
    %111 = vector.broadcast %109 : vector<10x1xf32> to vector<10x8xf32>
    %112 = vector.broadcast %110 : vector<1x8xf32> to vector<10x8xf32>
    %113 = arith.mulf %111, %112 : vector<10x8xf32>
    %114 = arith.addf %108, %113 : vector<10x8xf32>
    %115 = vector.extract_strided_slice %6 {offsets = [0, 7], sizes = [10, 1], strides = [1, 1]} : vector<10x10xf32> to vector<10x1xf32>
    %116 = vector.extract_strided_slice %73 {offsets = [7, 0], sizes = [1, 8], strides = [1, 1]} : vector<10x8xf32> to vector<1x8xf32>
    %117 = vector.broadcast %115 : vector<10x1xf32> to vector<10x8xf32>
    %118 = vector.broadcast %116 : vector<1x8xf32> to vector<10x8xf32>
    %119 = arith.mulf %117, %118 : vector<10x8xf32>
    %120 = arith.addf %114, %119 : vector<10x8xf32>
    %121 = vector.extract_strided_slice %6 {offsets = [0, 8], sizes = [10, 1], strides = [1, 1]} : vector<10x10xf32> to vector<10x1xf32>
    %122 = vector.extract_strided_slice %73 {offsets = [8, 0], sizes = [1, 8], strides = [1, 1]} : vector<10x8xf32> to vector<1x8xf32>
    %123 = vector.broadcast %121 : vector<10x1xf32> to vector<10x8xf32>
    %124 = vector.broadcast %122 : vector<1x8xf32> to vector<10x8xf32>
    %125 = arith.mulf %123, %124 : vector<10x8xf32>
    %126 = arith.addf %120, %125 : vector<10x8xf32>
    %127 = vector.extract_strided_slice %6 {offsets = [0, 9], sizes = [10, 1], strides = [1, 1]} : vector<10x10xf32> to vector<10x1xf32>
    %128 = vector.extract_strided_slice %73 {offsets = [9, 0], sizes = [1, 8], strides = [1, 1]} : vector<10x8xf32> to vector<1x8xf32>
    %129 = vector.broadcast %127 : vector<10x1xf32> to vector<10x8xf32>
    %130 = vector.broadcast %128 : vector<1x8xf32> to vector<10x8xf32>
    %131 = arith.mulf %129, %130 : vector<10x8xf32>
    %132 = arith.addf %126, %131 : vector<10x8xf32>
    %133 = vector.broadcast %7 : vector<10x1xf32> to vector<10x8xf32>
    %134 = arith.addf %132, %133 : vector<10x8xf32>
    %cst_8 = arith.constant dense<0.000000e+00> : vector<8xf32>
    %135 = vector.multi_reduction <add>, %134, %cst_8 [0] : vector<10x8xf32> to vector<8xf32>
    %136 = vector.shape_cast %135 : vector<8xf32> to vector<1x8xf32>
    %cst_9 = arith.constant 1.000000e+01 : f32
    %137 = vector.broadcast %cst_9 : f32 to vector<1x8xf32>
    %138 = arith.divf %136, %137 : vector<1x8xf32>
    %139 = arith.mulf %134, %134 : vector<10x8xf32>
    %cst_10 = arith.constant dense<0.000000e+00> : vector<8xf32>
    %140 = vector.multi_reduction <add>, %139, %cst_10 [0] : vector<10x8xf32> to vector<8xf32>
    %141 = vector.shape_cast %140 : vector<8xf32> to vector<1x8xf32>
    %cst_11 = arith.constant 1.000000e+01 : f32
    %142 = vector.broadcast %cst_11 : f32 to vector<1x8xf32>
    %143 = arith.divf %141, %142 : vector<1x8xf32>
    %144 = arith.mulf %138, %138 : vector<1x8xf32>
    %145 = arith.subf %143, %144 : vector<1x8xf32>
    %cst_12 = arith.constant 9.99999974E-6 : f32
    %146 = vector.broadcast %cst_12 : f32 to vector<1x8xf32>
    %147 = arith.addf %145, %146 : vector<1x8xf32>
    %148 = math.rsqrt %147 : vector<1x8xf32>
    %149 = arith.mulf %138, %148 : vector<1x8xf32>
    %150 = vector.broadcast %148 : vector<1x8xf32> to vector<10x8xf32>
    %151 = arith.mulf %134, %150 : vector<10x8xf32>
    %152 = vector.broadcast %149 : vector<1x8xf32> to vector<10x8xf32>
    %153 = arith.subf %151, %152 : vector<10x8xf32>
    %154 = vector.broadcast %8 : vector<10x1xf32> to vector<10x8xf32>
    %155 = arith.mulf %153, %154 : vector<10x8xf32>
    %156 = vector.broadcast %9 : vector<10x1xf32> to vector<10x8xf32>
    %157 = arith.addf %155, %156 : vector<10x8xf32>
    %cst_13 = arith.constant 0.000000e+00 : f32
    %158 = vector.broadcast %cst_13 : f32 to vector<10x8xf32>
    %159 = arith.maximumf %157, %158 : vector<10x8xf32>
    %160 = vector.extract_strided_slice %10 {offsets = [0, 0], sizes = [2, 1], strides = [1, 1]} : vector<2x10xf32> to vector<2x1xf32>
    %161 = vector.extract_strided_slice %159 {offsets = [0, 0], sizes = [1, 8], strides = [1, 1]} : vector<10x8xf32> to vector<1x8xf32>
    %162 = vector.broadcast %160 : vector<2x1xf32> to vector<2x8xf32>
    %163 = vector.broadcast %161 : vector<1x8xf32> to vector<2x8xf32>
    %164 = arith.mulf %162, %163 : vector<2x8xf32>
    %165 = vector.extract_strided_slice %10 {offsets = [0, 1], sizes = [2, 1], strides = [1, 1]} : vector<2x10xf32> to vector<2x1xf32>
    %166 = vector.extract_strided_slice %159 {offsets = [1, 0], sizes = [1, 8], strides = [1, 1]} : vector<10x8xf32> to vector<1x8xf32>
    %167 = vector.broadcast %165 : vector<2x1xf32> to vector<2x8xf32>
    %168 = vector.broadcast %166 : vector<1x8xf32> to vector<2x8xf32>
    %169 = arith.mulf %167, %168 : vector<2x8xf32>
    %170 = arith.addf %164, %169 : vector<2x8xf32>
    %171 = vector.extract_strided_slice %10 {offsets = [0, 2], sizes = [2, 1], strides = [1, 1]} : vector<2x10xf32> to vector<2x1xf32>
    %172 = vector.extract_strided_slice %159 {offsets = [2, 0], sizes = [1, 8], strides = [1, 1]} : vector<10x8xf32> to vector<1x8xf32>
    %173 = vector.broadcast %171 : vector<2x1xf32> to vector<2x8xf32>
    %174 = vector.broadcast %172 : vector<1x8xf32> to vector<2x8xf32>
    %175 = arith.mulf %173, %174 : vector<2x8xf32>
    %176 = arith.addf %170, %175 : vector<2x8xf32>
    %177 = vector.extract_strided_slice %10 {offsets = [0, 3], sizes = [2, 1], strides = [1, 1]} : vector<2x10xf32> to vector<2x1xf32>
    %178 = vector.extract_strided_slice %159 {offsets = [3, 0], sizes = [1, 8], strides = [1, 1]} : vector<10x8xf32> to vector<1x8xf32>
    %179 = vector.broadcast %177 : vector<2x1xf32> to vector<2x8xf32>
    %180 = vector.broadcast %178 : vector<1x8xf32> to vector<2x8xf32>
    %181 = arith.mulf %179, %180 : vector<2x8xf32>
    %182 = arith.addf %176, %181 : vector<2x8xf32>
    %183 = vector.extract_strided_slice %10 {offsets = [0, 4], sizes = [2, 1], strides = [1, 1]} : vector<2x10xf32> to vector<2x1xf32>
    %184 = vector.extract_strided_slice %159 {offsets = [4, 0], sizes = [1, 8], strides = [1, 1]} : vector<10x8xf32> to vector<1x8xf32>
    %185 = vector.broadcast %183 : vector<2x1xf32> to vector<2x8xf32>
    %186 = vector.broadcast %184 : vector<1x8xf32> to vector<2x8xf32>
    %187 = arith.mulf %185, %186 : vector<2x8xf32>
    %188 = arith.addf %182, %187 : vector<2x8xf32>
    %189 = vector.extract_strided_slice %10 {offsets = [0, 5], sizes = [2, 1], strides = [1, 1]} : vector<2x10xf32> to vector<2x1xf32>
    %190 = vector.extract_strided_slice %159 {offsets = [5, 0], sizes = [1, 8], strides = [1, 1]} : vector<10x8xf32> to vector<1x8xf32>
    %191 = vector.broadcast %189 : vector<2x1xf32> to vector<2x8xf32>
    %192 = vector.broadcast %190 : vector<1x8xf32> to vector<2x8xf32>
    %193 = arith.mulf %191, %192 : vector<2x8xf32>
    %194 = arith.addf %188, %193 : vector<2x8xf32>
    %195 = vector.extract_strided_slice %10 {offsets = [0, 6], sizes = [2, 1], strides = [1, 1]} : vector<2x10xf32> to vector<2x1xf32>
    %196 = vector.extract_strided_slice %159 {offsets = [6, 0], sizes = [1, 8], strides = [1, 1]} : vector<10x8xf32> to vector<1x8xf32>
    %197 = vector.broadcast %195 : vector<2x1xf32> to vector<2x8xf32>
    %198 = vector.broadcast %196 : vector<1x8xf32> to vector<2x8xf32>
    %199 = arith.mulf %197, %198 : vector<2x8xf32>
    %200 = arith.addf %194, %199 : vector<2x8xf32>
    %201 = vector.extract_strided_slice %10 {offsets = [0, 7], sizes = [2, 1], strides = [1, 1]} : vector<2x10xf32> to vector<2x1xf32>
    %202 = vector.extract_strided_slice %159 {offsets = [7, 0], sizes = [1, 8], strides = [1, 1]} : vector<10x8xf32> to vector<1x8xf32>
    %203 = vector.broadcast %201 : vector<2x1xf32> to vector<2x8xf32>
    %204 = vector.broadcast %202 : vector<1x8xf32> to vector<2x8xf32>
    %205 = arith.mulf %203, %204 : vector<2x8xf32>
    %206 = arith.addf %200, %205 : vector<2x8xf32>
    %207 = vector.extract_strided_slice %10 {offsets = [0, 8], sizes = [2, 1], strides = [1, 1]} : vector<2x10xf32> to vector<2x1xf32>
    %208 = vector.extract_strided_slice %159 {offsets = [8, 0], sizes = [1, 8], strides = [1, 1]} : vector<10x8xf32> to vector<1x8xf32>
    %209 = vector.broadcast %207 : vector<2x1xf32> to vector<2x8xf32>
    %210 = vector.broadcast %208 : vector<1x8xf32> to vector<2x8xf32>
    %211 = arith.mulf %209, %210 : vector<2x8xf32>
    %212 = arith.addf %206, %211 : vector<2x8xf32>
    %213 = vector.extract_strided_slice %10 {offsets = [0, 9], sizes = [2, 1], strides = [1, 1]} : vector<2x10xf32> to vector<2x1xf32>
    %214 = vector.extract_strided_slice %159 {offsets = [9, 0], sizes = [1, 8], strides = [1, 1]} : vector<10x8xf32> to vector<1x8xf32>
    %215 = vector.broadcast %213 : vector<2x1xf32> to vector<2x8xf32>
    %216 = vector.broadcast %214 : vector<1x8xf32> to vector<2x8xf32>
    %217 = arith.mulf %215, %216 : vector<2x8xf32>
    %218 = arith.addf %212, %217 : vector<2x8xf32>
    %219 = vector.broadcast %11 : vector<2x1xf32> to vector<2x8xf32>
    %220 = arith.addf %218, %219 : vector<2x8xf32>
    %221 = math.tanh %220 : vector<2x8xf32>
    %cst_14 = arith.constant 1.000000e+00 : f32
    %222 = vector.broadcast %cst_14 : f32 to vector<2x8xf32>
    %223 = arith.mulf %222, %221 : vector<2x8xf32>
    %c0_15 = arith.constant 0 : index
    %c0_16 = arith.constant 0 : index
    %224 = vector.load %arg3[%c0_15, %c0_16] : memref<2x8xf32, #tpu.memory_space<vmem>>, vector<2x8xf32>
    tpu.vector_store %arg3[%c0_15, %c0_16], %223 {strides = array<i32>} : memref<2x8xf32, #tpu.memory_space<vmem>>, vector<2x8xf32>,
    return
  }
  func.func @transform_0(%arg0: i32) -> (i32, i32) {
    %c0_i32 = arith.constant 0 : i32
    %c0_i32_0 = arith.constant 0 : i32
    return %c0_i32, %arg0 : i32, i32
  }
  func.func @transform_1(%arg0: i32) -> (i32, i32) {
    %c0_i32 = arith.constant 0 : i32
    %c0_i32_0 = arith.constant 0 : i32
    %c0_i32_1 = arith.constant 0 : i32
    return %c0_i32, %c0_i32_0 : i32, i32
  }
  func.func @transform_2(%arg0: i32) -> (i32, i32) {
    %c0_i32 = arith.constant 0 : i32
    %c0_i32_0 = arith.constant 0 : i32
    return %c0_i32, %arg0 : i32, i32
  }
}

</mosaic_0001>

<bundles_post_ra>
// kernel: tpu_custom_call.1
= control target key start
LH: loop header
LB: loop body
LE: loop exit
PB: predicated region body
PF: predicated region fallthrough
CT: control target
= control target key end

     0   :  { %7 = vsyncpa [#allocation3], 0  ;;  %s936_s0 = inlined_call_operand.hbm [shape: f32[6,8], index: 0, kind: input, shape index: {}]   ;;  %s937_s1 = inlined_call_operand.hbm [shape: f32[10,33], index: 1, kind: input, shape index: {}]   ;;  %s938_s2 = inlined_call_operand.hbm [shape: f32[2,8], index: 2, kind: output, shape index: {}]  }
   0x1   :  { %8 = vsyncpa [#allocation6], 0 }
   0x2   :  { %9 = vsyncpa [#allocation4], 0  ;;  %s712_s9 = smov [#allocation2]   ;;  %s713_s11 = smov [#allocation5]  }
   0x3   :  { %s16_s10 = sshll.u32 %s712_s9, 4  ;;  %s25_s12 = sshll.u32 %s713_s11, 4  ;;  %s17_s10 = int_to_ptr.vmem [resolvable:$true] %s16_s10  ;;  %s765_s12 = int_to_ptr.vmem [resolvable:$true] %s25_s12 }
   0x4   :  { %s640_s15 = scalar_lea.hbm %s936_s0, 128 }
   0x5   :  { %p641_p0 = scmp.ne.s32.totalorder %s936_s0, %s640_s15  ;;  %p644_p1 = scmp.lt.u32.totalorder %s640_s15, %s936_s0 }
   0x7   :  { %p646_p2 = pnand %p644_p1, %p641_p0 }
   0x9   :  { %649 = shalt.err (!%p646_p2)
}
   0xa   :  { %s650_s20 = scalar_lea.vmem %s17_s10, 128  ;;  %p655_p4 = scmp.lt.s32.totalorder %s17_s10, %s17_s10 }
   0xb   :  { %p651_p3 = scmp.ne.s32.totalorder %s17_s10, %s650_s20  ;;  %p656_p5 = scmp.lt.s32.totalorder %s650_s20, %s650_s20 }
   0xd   :  { %p657_p6 = por %p656_p5, %p655_p4 }
   0xf   :  { %p658_p7 = pnand %p657_p6, %p651_p3 }
  0x11   :  { %661 = shalt.err (!%p658_p7)
}
  0x12   :  { %19 = dma.hbm_to_vmem [thread:$0]  %s936_s0, 128, %s17_s10, [#allocation3]  }
  0x13   :  { %s662_s25 = scalar_lea.hbm %s937_s1, 256 }
  0x14   :  { %p663_p8 = scmp.ne.s32.totalorder %s937_s1, %s662_s25  ;;  %p666_p9 = scmp.lt.u32.totalorder %s662_s25, %s937_s1 }
  0x16   :  { %p668_p10 = pnand %p666_p9, %p663_p8 }
  0x18   :  { %671 = shalt.err (!%p668_p10)
}
  0x19   :  { %s672_s30 = scalar_lea.vmem %s765_s12, 256  ;;  %p677_p12 = scmp.lt.s32.totalorder %s765_s12, %s765_s12 }
  0x1a   :  { %p673_p11 = scmp.ne.s32.totalorder %s765_s12, %s672_s30  ;;  %p678_p13 = scmp.lt.s32.totalorder %s672_s30, %s672_s30 }
  0x1c   :  { %p679_p0 = por %p678_p13, %p677_p12 }
  0x1e   :  { %p680_p1 = pnand %p679_p0, %p673_p11 }
  0x20   :  { %683 = shalt.err (!%p680_p1)
}
  0x21   :  { %s714_s0 = smov 128   ;;  %s715_s3 = smov 8  }
  0x22   :  { %31 = dma.hbm_to_vmem [thread:$0]  %s937_s1, 256, %s765_s12, [#allocation6], %s714_s0, %s714_s0, %s715_s3  }
  0x23   :  { %706 = dma.done.wait [#allocation3], 128  }
  0x24   :  { %707 = vsyncadd [#allocation3], 4294967168 }
  0x25   :  { %708 = dma.done.wait [#allocation6], 256  }
  0x26   :  { %709 = vsyncadd [#allocation6], 4294967040  ;;  %v716_v0 = vmov 1   ;;  %v717_v1 = vmov 0   ;;  %v796_v2 = vld [vmem:[#allocation5] sm:$0xff]  ;;  %v718_v4 = vmov 2   ;;  %v51_v29 = vlaneseq }
  0x27   :  { %585 = vset.pattern.permute.xlu1 %v716_v0  ;;  %584 = vset.pattern.permute.xlu0 %v717_v1  ;;  %v800_v3 = vld [vmem:[#allocation5 + $0x8] sm:$0x3]  ;;  %v719_v5 = vmov 3   ;;  %v720_v6 = vmov 4   ;;  %v721_v7 = vmov 5   ;;  %v722_v8 = vmov 6  }
  0x28   :  { %58 = vperm.xlu1 %585, %v796_v2   ;;  %43 = vperm.xlu0 %584, %v796_v2   ;;  %v723_v9 = vmov 9   ;;  %v724_v10 = vmov 10   ;;  %v725_v11 = vmov 7   ;;  %v726_v12 = vmov 12   ;;  %v38_v39 = vld [vmem:[#allocation2] sm:$0x3f] }
  0x29   :  { %v727_v13 = vmov 8   ;;  %v728_v14 = vmov 13   ;;  %v729_v15 = vmov 14   ;;  %v730_v16 = vmov 15   ;;  %s749_s1 = smov [#allocation7]  }
  0x2a   :  { %v731_v17 = vmov 11   ;;  %v732_v18 = vmov 17   ;;  %v733_v19 = vmov 18   ;;  %v734_v20 = vmov 20   ;;  %s536_s6 = sshll.u32 %s749_s1, 4  ;;  %s537_s6 = int_to_ptr.vmem [resolvable:$true] %s536_s6 }
  0x2b   :  { %v735_v21 = vmov 23   ;;  %v736_v22 = vmov 27   ;;  %v737_v23 = vmov 30   ;;  %v738_v24 = vmov 32   ;;  %s684_s7 = scalar_lea.vmem %s537_s6, 32  ;;  %p689_p3 = scmp.lt.s32.totalorder %s537_s6, %s537_s6 }
  0x2c   :  { %62 = vperm.xlu1 %585, %v800_v3   ;;  %48 = vperm.xlu0 %584, %v800_v3   ;;  %v739_v25 = vmov 16   ;;  %v740_v26 = vmov 19   ;;  %v741_v27 = vmov 21   ;;  %v742_v31 = vmov 22   ;;  %p685_p2 = scmp.ne.s32.totalorder %s537_s6, %s684_s7  ;;  %p690_p4 = scmp.lt.s32.totalorder %s684_s7, %s684_s7 }
  0x2d   :  { %v848_v33 = vshrl.u32 %v51_v29, 7  ;;  %v743_v34 = vmov 24   ;;  %v744_v41 = vmov 25   ;;  %v745_v49 = vmov 26  }
  0x2e   :  { %vm149_vm0 = vcmask 58368   ;;  %vm147_vm1 = vcmask 64512   ;;  %p691_p5 = por %p690_p4, %p689_p3 }
  0x2f   :  { %v852_v37 = vsub.s32 1, %v848_v33  ;;  %v855_v38 = vsub.s32 0, %v848_v33  ;;  %v858_v40 = vsub.s32 2, %v848_v33  ;;  %v864_v45 = vsub.s32 3, %v848_v33 }
  0x30   :  { %587 = vset.pattern.permute.xlu1 %v718_v4  ;;  %586 = vset.pattern.permute.xlu0 %v718_v4  ;;  %v868_v48 = vsub.s32 4, %v848_v33  ;;  %v874_v59 = vsub.s32 5, %v848_v33  ;;  %p692_p6 = pnand %p691_p5, %p685_p2 }
  0x31   :  { %78 = vperm.xlu1 %587, %v800_v3   ;;  %74 = vperm.xlu0 %586, %v796_v2   ;;  %v68_v42 = vrot.slane %v38_v39, %v852_v37  ;;  %v54_v43 = vrot.slane %v38_v39, %v855_v38  ;;  %v84_v47 = vrot.slane %v38_v39, %v858_v40 }
  0x32   :  { %v100_v52 = vrot.slane %v38_v39, %v864_v45  ;;  %v116_v58 = vrot.slane %v38_v39, %v868_v48 }
  0x35   :  { %588 = vset.pattern.permute.xlu1 %v719_v5  ;;  %589 = vset.pattern.permute.xlu0 %v719_v5 }
  0x36   :  { %90 = vperm.xlu1 %588, %v796_v2   ;;  %94 = vperm.xlu0 %589, %v800_v3  }
  0x3a   :  { %590 = vset.pattern.permute.xlu1 %v720_v6  ;;  %591 = vset.pattern.permute.xlu0 %v721_v7  ;;  %v132_v6 = vrot.slane %v38_v39, %v874_v59 }
  0x3b   :  { %106 = vperm.xlu1 %590, %v796_v2   ;;  %122 = vperm.xlu0 %591, %v796_v2  }
  0x3f   :  { %110 = vperm.xlu1 %590, %v800_v3   ;;  %594 = vset.pattern.permute.xlu0 %v722_v8 }
  0x40   :  { %142 = vperm.xlu0 %594, %v800_v3  }
  0x43   :  { %592 = vset.pattern.permute.xlu1 %v721_v7 }
  0x44   :  { %126 = vperm.xlu1 %592, %v800_v3   ;;  %597 = vset.pattern.permute.xlu0 %v723_v9 }
  0x45   :  { %204 = vperm.xlu0 %597, %v796_v2  }
  0x48   :  { %593 = vset.pattern.permute.xlu1 %v722_v8 }
  0x49   :  { %138 = vperm.xlu1 %593, %v796_v2   ;;  %600 = vset.pattern.permute.xlu0 %v724_v10 }
  0x4a   :  { %222 = vperm.xlu0 %600, %v800_v3  }
  0x4d   :  { %595 = vset.pattern.permute.xlu1 %v725_v11 }
  0x4e   :  { %182 = vperm.xlu1 %595, %v796_v2   ;;  %602 = vset.pattern.permute.xlu0 %v726_v12 }
  0x4f   :  { %250 = vperm.xlu0 %602, %v796_v2  }
  0x52   :  { %596 = vset.pattern.permute.xlu1 %v727_v13 }
  0x53   :  { %192 = vperm.xlu1 %596, %v796_v2   ;;  %605 = vset.pattern.permute.xlu0 %v728_v14 }
  0x54   :  { %266 = vperm.xlu0 %605, %v796_v2  }
  0x57   :  { %598 = vset.pattern.permute.xlu1 %v723_v9 }
  0x58   :  { %208 = vperm.xlu1 %598, %v800_v3   ;;  %608 = vset.pattern.permute.xlu0 %v729_v15 }
  0x59   :  { %282 = vperm.xlu0 %608, %v796_v2  }
  0x5c   :  { %599 = vset.pattern.permute.xlu1 %v724_v10 }
  0x5d   :  { %218 = vperm.xlu1 %599, %v796_v2   ;;  %611 = vset.pattern.permute.xlu0 %v730_v16 }
  0x5e   :  { %302 = vperm.xlu0 %611, %v800_v3  }
  0x61   :  { %601 = vset.pattern.permute.xlu1 %v731_v17 }
  0x62   :  { %234 = vperm.xlu1 %601, %v796_v2   ;;  %613 = vset.pattern.permute.xlu0 %v732_v18 }
  0x63   :  { %330 = vperm.xlu0 %613, %v796_v2  }
  0x66   :  { %238 = vperm.xlu1 %601, %v800_v3  }
  0x67   :  { %616 = vset.pattern.permute.xlu0 %v733_v19 }
  0x68   :  { %350 = vperm.xlu0 %616, %v800_v3  }
  0x6a   :  { %603 = vset.pattern.permute.xlu1 %v726_v12  ;;  %v746_v12 = vmov 28  }
  0x6b   :  { %254 = vperm.xlu1 %603, %v800_v3  }
  0x6c   :  { %618 = vset.pattern.permute.xlu0 %v734_v20 }
  0x6d   :  { %403 = vperm.xlu0 %618, %v796_v2  }
  0x6f   :  { %604 = vset.pattern.permute.xlu1 %v725_v11 }
  0x70   :  { %186 = vperm.xlu1 %604, %v800_v3  }
  0x71   :  { %621 = vset.pattern.permute.xlu0 %v735_v21 }
  0x72   :  { %434 = vperm.xlu0 %621, %v796_v2  }
  0x74   :  { %606 = vset.pattern.permute.xlu1 %v728_v14 }
  0x75   :  { %270 = vperm.xlu1 %606, %v800_v3  }
  0x76   :  { %624 = vset.pattern.permute.xlu0 %v734_v20  ;;  %v747_v20 = vmov 29  }
  0x77   :  { %407 = vperm.xlu0 %624, %v800_v3  }
  0x79   :  { %607 = vset.pattern.permute.xlu1 %v727_v13 }
  0x7a   :  { %196 = vperm.xlu1 %607, %v800_v3  }
  0x7b   :  { %627 = vset.pattern.permute.xlu0 %v736_v22 }
  0x7c   :  { %474 = vperm.xlu0 %627, %v796_v2  }
  0x7e   :  { %609 = vset.pattern.permute.xlu1 %v729_v15 }
  0x7f   :  { %286 = vperm.xlu1 %609, %v800_v3  }
  0x80   :  { %630 = vset.pattern.permute.xlu0 %v737_v23 }
  0x81   :  { %504 = vperm.xlu0 %630, %v796_v2  }
  0x83   :  { %610 = vset.pattern.permute.xlu1 %v730_v16 }
  0x84   :  { %298 = vperm.xlu1 %610, %v796_v2  }
  0x85   :  { %633 = vset.pattern.permute.xlu0 %v738_v24 }
  0x88   :  { %612 = vset.pattern.permute.xlu1 %v739_v25 }
  0x89   :  { %314 = vperm.xlu1 %612, %v796_v2  }
  0x8d   :  { %318 = vperm.xlu1 %612, %v800_v3  }
  0x91   :  { %614 = vset.pattern.permute.xlu1 %v732_v18 }
  0x92   :  { %334 = vperm.xlu1 %614, %v800_v3  }
  0x96   :  { %615 = vset.pattern.permute.xlu1 %v733_v19 }
  0x97   :  { %346 = vperm.xlu1 %615, %v796_v2  }
  0x9b   :  { %617 = vset.pattern.permute.xlu1 %v740_v26 }
  0x9c   :  { %362 = vperm.xlu1 %617, %v796_v2  }
  0xa0   :  { %366 = vperm.xlu1 %617, %v800_v3  }
  0xa4   :  { %619 = vset.pattern.permute.xlu1 %v741_v27 }
  0xa5   :  { %413 = vperm.xlu1 %619, %v796_v2  }
  0xa7   :  { %v59_v28 = vpop.permute.xlu1 %58  ;;  %v44_v30 = vpop.permute.xlu0 %43 }
  0xa8   :  { %v69_v50 = vmul.f32 %v68_v42, %v59_v28  ;;  %v55_v51 = vmul.f32 %v54_v43, %v44_v30 }
  0xa9   :  { %620 = vset.pattern.permute.xlu1 %v742_v31  ;;  %v748_v31 = vmov 31  }
  0xaa   :  { %425 = vperm.xlu1 %620, %v796_v2   ;;  %v71_v61 = vadd.f32 %v69_v50, %v55_v51 }
  0xab   :  { %v63_v32 = vpop.permute.xlu1 %62  ;;  %v49_v35 = vpop.permute.xlu0 %48 }
  0xac   :  { %v70_v53 = vmul.f32 %v68_v42, %v63_v32  ;;  %v56_v54 = vmul.f32 %v54_v43, %v49_v35 }
  0xae   :  { %622 = vset.pattern.permute.xlu1 %v743_v34  ;;  %v72_v63 = vadd.f32 %v70_v53, %v56_v54 }
  0xaf   :  { %444 = vperm.xlu1 %622, %v796_v2  }
  0xb0   :  { %v79_v36 = vpop.permute.xlu1 %78  ;;  %v75_v44 = vpop.permute.xlu0 %74 }
  0xb1   :  { %v85_v56 = vmul.f32 %v84_v47, %v75_v44  ;;  %v86_v60 = vmul.f32 %v84_v47, %v79_v36 }
  0xb3   :  { %623 = vset.pattern.permute.xlu1 %v744_v41  ;;  %v87_v4 = vadd.f32 %v85_v56, %v71_v61  ;;  %v88_v7 = vadd.f32 %v86_v60, %v72_v63 }
  0xb4   :  { %454 = vperm.xlu1 %623, %v796_v2  }
  0xb5   :  { %v91_v46 = vpop.permute.xlu1 %90  ;;  %v95_v57 = vpop.permute.xlu0 %94 }
  0xb6   :  { %v101_v62 = vmul.f32 %v100_v52, %v91_v46  ;;  %v102_v0 = vmul.f32 %v100_v52, %v95_v57 }
  0xb8   :  { %625 = vset.pattern.permute.xlu1 %v745_v49  ;;  %v103_v10 = vadd.f32 %v101_v62, %v87_v4  ;;  %v104_v11 = vadd.f32 %v102_v0, %v88_v7 }
  0xb9   :  { %464 = vperm.xlu1 %625, %v796_v2  }
  0xba   :  { %v107_v55 = vpop.permute.xlu1 %106  ;;  %v123_v8 = vpop.permute.xlu0 %122 }
  0xbb   :  { %v117_v5 = vmul.f32 %v116_v58, %v107_v55  ;;  %v133_v14 = vmul.f32 %v132_v6, %v123_v8 }
  0xbd   :  { %626 = vset.pattern.permute.xlu1 %v741_v27  ;;  %v119_v13 = vadd.f32 %v117_v5, %v103_v10 }
  0xbe   :  { %v111_v1 = vpop.permute.xlu1 %110  ;;  %417 = vperm.xlu1 %626, %v800_v3  }
  0xbf   :  { %v118_v9 = vmul.f32 %v116_v58, %v111_v1  ;;  %v143_v18 = vpop.permute.xlu0 %142  ;;  %v135_v19 = vadd.f32 %v133_v14, %v119_v13 }
  0xc1   :  { %v120_v16 = vadd.f32 %v118_v9, %v104_v11 }
  0xc2   :  { %628 = vset.pattern.permute.xlu1 %v746_v12 }
  0xc3   :  { %v127_v15 = vpop.permute.xlu1 %126  ;;  %484 = vperm.xlu1 %628, %v796_v2  }
  0xc4   :  { %v134_v17 = vmul.f32 %v132_v6, %v127_v15  ;;  %v205_v5 = vpop.permute.xlu0 %204 }
  0xc6   :  { %v136_v3 = vadd.f32 %v134_v17, %v120_v16 }
  0xc7   :  { %629 = vset.pattern.permute.xlu1 %v747_v20 }
  0xc8   :  { %v879_v21 = vadd.f32 %v143_v18, %v136_v3  ;;  %v139_v22 = vpop.permute.xlu1 %138  ;;  %494 = vperm.xlu1 %629, %v796_v2  }
  0xc9   :  { %v145_v23 = vadd.f32 %v139_v22, %v135_v19  ;;  %v223_v11 = vpop.permute.xlu0 %222 }
  0xca   :  { %v150_v25 = vsel %vm149_vm0, %v879_v21, 0.0  ;;  %v161_v26 = vmul.f32 %v879_v21, %v879_v21 }
  0xcb   :  { %v148_v27 = vsel %vm147_vm1, %v145_v23, 0.0  ;;  %v160_v28 = vmul.f32 %v145_v23, %v145_v23 }
  0xcc   :  { %v163_v29 = vsel %vm149_vm0, %v161_v26, 0.0  ;;  %v151_v30 = vadd.f32 %v150_v25, %v148_v27  ;;  %631 = vset.pattern.permute.xlu1 %v748_v31 }
  0xcd   :  { %v162_v32 = vsel %vm147_vm1, %v160_v28, 0.0  ;;  %v183_v34 = vpop.permute.xlu1 %182  ;;  %514 = vperm.xlu1 %631, %v796_v2  }
  0xce   :  { %v152_v35 = vrot.slane %v151_v30, 4  ;;  %v164_v36 = vadd.f32 %v163_v29, %v162_v32  ;;  %v251_v18 = vpop.permute.xlu0 %250 }
  0xd0   :  { %v153_v39 = vadd.f32 %v152_v35, %v151_v30  ;;  %v165_v41 = vrot.slane %v164_v36, 4 }
  0xd1   :  { %632 = vset.pattern.permute.xlu1 %v738_v24 }
  0xd2   :  { %v154_v42 = vrot.slane %v153_v39, 2  ;;  %v166_v43 = vadd.f32 %v165_v41, %v164_v36  ;;  %v193_v44 = vpop.permute.xlu1 %192  ;;  %524 = vperm.xlu1 %632, %v796_v2  }
  0xd3   :  { %v267_v28 = vpop.permute.xlu0 %266 }
  0xd4   :  { %v167_v46 = vrot.slane %v166_v43, 2  ;;  %v155_v47 = vadd.f32 %v154_v42, %v153_v39 }
  0xd6   :  { %v168_v49 = vadd.f32 %v167_v46, %v166_v43  ;;  %v156_v50 = vrot.slane %v155_v47, 1  ;;  %v307_v46 = vsub.s32 6, %v848_v33 }
  0xd7   :  { %v209_v51 = vpop.permute.xlu1 %208 }
  0xd8   :  { %v169_v52 = vrot.slane %v168_v49, 1  ;;  %v157_v53 = vadd.f32 %v156_v50, %v155_v47  ;;  %v283_v43 = vpop.permute.xlu0 %282 }
  0xda   :  { %v159_v54 = vmul.f32 0.1, %v157_v53  ;;  %v170_v55 = vadd.f32 %v169_v52, %v168_v49 }
  0xdc   :  { %v171_v56 = vmul.f32 0.1, %v170_v55  ;;  %v172_v57 = vmul.f32 %v159_v54, %v159_v54  ;;  %v219_v58 = vpop.permute.xlu1 %218 }
  0xde   :  { %v173_v60 = vsub.f32 %v171_v56, %v172_v57 }
  0xe0   :  { %v174_v61 = vadd.f32 1e-05, %v173_v60 }
  0xe1   :  { %v235_v24 = vpop.permute.xlu1 %234 }
  0xe2   :  { %634 = vrsqrt.f32 %v174_v61 }
  0xe5   :  { %v239_v62 = vpop.permute.xlu1 %238 }
  0xea   :  { %v255_v63 = vpop.permute.xlu1 %254 }
  0xec   :  { %v635_v0 = vpop.eup %634 }
  0xed   :  { %v176_v2 = vmul.f32 %v635_v0, %v159_v54  ;;  %v177_v1 = vmul.f32 %v635_v0, %v145_v23  ;;  %v178_v26 = vmul.f32 %v635_v0, %v879_v21 }
  0xef   :  { %v179_v4 = vsub.f32 %v177_v1, %v176_v2  ;;  %v187_v6 = vpop.permute.xlu1 %186  ;;  %v180_v31 = vsub.f32 %v178_v26, %v176_v2 }
  0xf1   :  { %v189_v7 = vmul.f32 %v183_v34, %v179_v4  ;;  %v190_v41 = vmul.f32 %v187_v6, %v180_v31 }
  0xf3   :  { %v199_v8 = vadd.f32 %v193_v44, %v189_v7 }
  0xf4   :  { %v271_v9 = vpop.permute.xlu1 %270 }
  0xf5   :  { %v201_v10 = vmax.f32 %v199_v8, 0.0 }
  0xf7   :  { %v214_v12 = vrot.slane %v201_v10, %v855_v38  ;;  %v228_v13 = vrot.slane %v201_v10, %v852_v37  ;;  %v244_v17 = vrot.slane %v201_v10, %v858_v40  ;;  %v260_v25 = vrot.slane %v201_v10, %v864_v45 }
  0xf8   :  { %v276_v32 = vrot.slane %v201_v10, %v868_v48  ;;  %v292_v44 = vrot.slane %v201_v10, %v874_v59  ;;  %v308_v54 = vrot.slane %v201_v10, %v307_v46 }
  0xf9   :  { %v229_v14 = vmul.f32 %v228_v13, %v219_v58  ;;  %v215_v15 = vmul.f32 %v214_v12, %v205_v5  ;;  %v197_v16 = vpop.permute.xlu1 %196  ;;  %v216_v19 = vmul.f32 %v214_v12, %v209_v51  ;;  %v230_v20 = vmul.f32 %v228_v13, %v223_v11  ;;  %v303_v58 = vpop.permute.xlu0 %302 }
  0xfa   :  { %v245_v23 = vmul.f32 %v244_v17, %v235_v24  ;;  %v261_v30 = vmul.f32 %v260_v25, %v251_v18  ;;  %v246_v35 = vmul.f32 %v244_v17, %v239_v62  ;;  %v277_v42 = vmul.f32 %v276_v32, %v267_v28 }
  0xfb   :  { %v231_v3 = vadd.f32 %v229_v14, %v215_v15  ;;  %v232_v29 = vadd.f32 %v230_v20, %v216_v19  ;;  %v262_v47 = vmul.f32 %v260_v25, %v255_v63  ;;  %v200_v50 = vadd.f32 %v197_v16, %v190_v41 }
  0xfc   :  { %v323_v51 = vsub.s32 7, %v848_v33  ;;  %v293_v53 = vmul.f32 %v292_v44, %v283_v43  ;;  %v278_v55 = vmul.f32 %v276_v32, %v271_v9  ;;  %v310_v8 = vmul.f32 %v308_v54, %v303_v58 }
  0xfd   :  { %v247_v27 = vadd.f32 %v245_v23, %v231_v3  ;;  %v248_v39 = vadd.f32 %v246_v35, %v232_v29  ;;  %v202_v60 = vmax.f32 %v200_v50, 0.0  ;;  %v331_v6 = vpop.permute.xlu0 %330 }
  0xfe   :  { %v287_v22 = vpop.permute.xlu1 %286  ;;  %v324_v24 = vrot.slane %v201_v10, %v323_v51 }
  0xff   :  { %v263_v36 = vadd.f32 %v261_v30, %v247_v27  ;;  %v264_v52 = vadd.f32 %v262_v47, %v248_v39  ;;  %v294_v0 = vmul.f32 %v292_v44, %v287_v22  ;;  %v340_v2 = vrot.slane %v202_v60, %v855_v38 }
 0x100   :  { %v356_v12 = vrot.slane %v202_v60, %v852_v37 }
 0x101   :  { %v279_v49 = vadd.f32 %v277_v42, %v263_v36  ;;  %v280_v62 = vadd.f32 %v278_v55, %v264_v52  ;;  %v341_v11 = vmul.f32 %v340_v2, %v331_v6  ;;  %v351_v18 = vpop.permute.xlu0 %350 }
 0x102   :  { %v358_v22 = vmul.f32 %v356_v12, %v351_v18 }
 0x103   :  { %v299_v34 = vpop.permute.xlu1 %298  ;;  %v295_v57 = vadd.f32 %v293_v53, %v279_v49  ;;  %v296_v5 = vadd.f32 %v294_v0, %v280_v62 }
 0x104   :  { %v309_v61 = vmul.f32 %v308_v54, %v299_v34 }
 0x105   :  { %v312_v13 = vadd.f32 %v310_v8, %v296_v5  ;;  %v404_v0 = vpop.permute.xlu0 %403 }
 0x106   :  { %v311_v1 = vadd.f32 %v309_v61, %v295_v57 }
 0x108   :  { %v315_v21 = vpop.permute.xlu1 %314 }
 0x109   :  { %v325_v63 = vmul.f32 %v324_v24, %v315_v21  ;;  %v435_v6 = vpop.permute.xlu0 %434 }
 0x10b   :  { %v327_v7 = vadd.f32 %v325_v63, %v311_v1 }
 0x10c   :  { %v319_v56 = vpop.permute.xlu1 %318 }
 0x10d   :  { %v326_v9 = vmul.f32 %v324_v24, %v319_v56  ;;  %v343_v10 = vadd.f32 %v341_v11, %v327_v7 }
 0x10f   :  { %v328_v17 = vadd.f32 %v326_v9, %v312_v13 }
 0x111   :  { %v335_v4 = vpop.permute.xlu1 %334 }
 0x112   :  { %v342_v14 = vmul.f32 %v340_v2, %v335_v4 }
 0x114   :  { %v344_v19 = vadd.f32 %v342_v14, %v328_v17  ;;  %v408_v14 = vpop.permute.xlu0 %407 }
 0x116   :  { %v347_v15 = vpop.permute.xlu1 %346  ;;  %v360_v25 = vadd.f32 %v358_v22, %v344_v19 }
 0x117   :  { %v357_v16 = vmul.f32 %v356_v12, %v347_v15 }
 0x119   :  { %v359_v3 = vadd.f32 %v357_v16, %v343_v10 }
 0x11b   :  { %v363_v20 = vpop.permute.xlu1 %362 }
 0x11c   :  { %v369_v23 = vadd.f32 %v363_v20, %v359_v3 }
 0x11e   :  { %v381_v27 = vmul.f32 %v369_v23, %v369_v23  ;;  %v371_v29 = vsel %vm147_vm1, %v369_v23, 0.0 }
 0x11f   :  { %v367_v26 = vpop.permute.xlu1 %366 }
 0x120   :  { %v370_v28 = vadd.f32 %v367_v26, %v360_v25  ;;  %v383_v34 = vsel %vm147_vm1, %v381_v27, 0.0 }
 0x122   :  { %v372_v30 = vsel %vm149_vm0, %v370_v28, 0.0  ;;  %v382_v31 = vmul.f32 %v370_v28, %v370_v28 }
 0x123   :  { %v373_v32 = vadd.f32 %v372_v30, %v371_v29 }
 0x124   :  { %v384_v35 = vsel %vm149_vm0, %v382_v31, 0.0  ;;  %v414_v50 = vpop.permute.xlu1 %413  ;;  %v475_v31 = vpop.permute.xlu0 %474 }
 0x125   :  { %v374_v36 = vrot.slane %v373_v32, 4  ;;  %v385_v39 = vadd.f32 %v384_v35, %v383_v34 }
 0x127   :  { %v375_v41 = vadd.f32 %v374_v36, %v373_v32  ;;  %v386_v42 = vrot.slane %v385_v39, 4 }
 0x129   :  { %v376_v43 = vrot.slane %v375_v41, 2  ;;  %v387_v44 = vadd.f32 %v386_v42, %v385_v39  ;;  %v426_v57 = vpop.permute.xlu1 %425 }
 0x12b   :  { %v388_v47 = vrot.slane %v387_v44, 2  ;;  %v377_v21 = vadd.f32 %v376_v43, %v375_v41 }
 0x12d   :  { %v389_v49 = vadd.f32 %v388_v47, %v387_v44  ;;  %v378_v52 = vrot.slane %v377_v21, 1  ;;  %v505_v44 = vpop.permute.xlu0 %504 }
 0x12e   :  { %v445_v62 = vpop.permute.xlu1 %444 }
 0x12f   :  { %v390_v53 = vrot.slane %v389_v49, 1  ;;  %v379_v54 = vadd.f32 %v378_v52, %v377_v21 }
 0x131   :  { %v380_v55 = vmul.f32 0.1, %v379_v54  ;;  %v391_v56 = vadd.f32 %v390_v53, %v389_v49 }
 0x133   :  { %v392_v58 = vmul.f32 0.1, %v391_v56  ;;  %v393_v60 = vmul.f32 %v380_v55, %v380_v55  ;;  %v455_v63 = vpop.permute.xlu1 %454 }
 0x135   :  { %v394_v61 = vsub.f32 %v392_v58, %v393_v60 }
 0x137   :  { %v395_v24 = vadd.f32 1e-05, %v394_v61 }
 0x138   :  { %v465_v5 = vpop.permute.xlu1 %464 }
 0x139   :  { %636 = vrsqrt.f32 %v395_v24 }
 0x13d   :  { %v418_v13 = vpop.permute.xlu1 %417 }
 0x142   :  { %v485_v22 = vpop.permute.xlu1 %484 }
 0x143   :  { %v637_v2 = vpop.eup %636 }
 0x144   :  { %v397_v1 = vmul.f32 %v637_v2, %v380_v55  ;;  %v398_v4 = vmul.f32 %v637_v2, %v369_v23  ;;  %v399_v8 = vmul.f32 %v637_v2, %v370_v28 }
 0x146   :  { %v400_v7 = vsub.f32 %v398_v4, %v397_v1  ;;  %v401_v12 = vsub.f32 %v399_v8, %v397_v1 }
 0x147   :  { %v495_v36 = vpop.permute.xlu1 %494 }
 0x148   :  { %v410_v9 = vmul.f32 %v404_v0, %v400_v7  ;;  %v411_v18 = vmul.f32 %v408_v14, %v401_v12 }
 0x14a   :  { %v420_v11 = vadd.f32 %v414_v50, %v410_v9  ;;  %v421_v26 = vadd.f32 %v418_v13, %v411_v18 }
 0x14c   :  { %v422_v15 = vmax.f32 %v420_v11, 0.0  ;;  %v515_v49 = vpop.permute.xlu1 %514 }
 0x14e   :  { %v431_v16 = vrot.slane %v422_v15, %v855_v38  ;;  %v440_v10 = vrot.slane %v422_v15, %v852_v37  ;;  %v450_v17 = vrot.slane %v422_v15, %v858_v40  ;;  %v460_v20 = vrot.slane %v422_v15, %v864_v45 }
 0x14f   :  { %v470_v27 = vrot.slane %v422_v15, %v868_v48  ;;  %v480_v30 = vrot.slane %v422_v15, %v874_v59  ;;  %v490_v32 = vrot.slane %v422_v15, %v307_v46  ;;  %v423_v40 = vmax.f32 %v421_v26, 0.0 }
 0x150   :  { %v432_v3 = vmul.f32 %v431_v16, %v426_v57  ;;  %v441_v19 = vmul.f32 %v440_v10, %v435_v6  ;;  %v451_v25 = vmul.f32 %v450_v17, %v445_v62  ;;  %v461_v29 = vmul.f32 %v460_v20, %v455_v63 }
 0x151   :  { %v471_v35 = vmul.f32 %v470_v27, %v465_v5  ;;  %v500_v45 = vrot.slane %v422_v15, %v323_v51  ;;  %v481_v41 = vmul.f32 %v480_v30, %v475_v31  ;;  %v491_v42 = vmul.f32 %v490_v32, %v485_v22  ;;  %v525_v54 = vpop.permute.xlu1 %524 }
 0x152   :  { %v442_v23 = vadd.f32 %v441_v19, %v432_v3  ;;  %v510_v48 = vrot.slane %v423_v40, %v855_v38  ;;  %v520_v21 = vrot.slane %v423_v40, %v852_v37 }
 0x153   :  { %v501_v47 = vmul.f32 %v500_v45, %v495_v36 }
 0x154   :  { %v452_v28 = vadd.f32 %v451_v25, %v442_v23  ;;  %v511_v50 = vmul.f32 %v510_v48, %v505_v44  ;;  %v521_v52 = vmul.f32 %v520_v21, %v515_v49 }
 0x156   :  { %v462_v34 = vadd.f32 %v461_v29, %v452_v28 }
 0x158   :  { %v472_v39 = vadd.f32 %v471_v35, %v462_v34 }
 0x15a   :  { %v482_v43 = vadd.f32 %v481_v41, %v472_v39 }
 0x15c   :  { %v492_v59 = vadd.f32 %v491_v42, %v482_v43 }
 0x15e   :  { %v502_v46 = vadd.f32 %v501_v47, %v492_v59 }
 0x160   :  { %v512_v53 = vadd.f32 %v511_v50, %v502_v46 }
 0x162   :  { %v522_v55 = vadd.f32 %v521_v52, %v512_v53 }
 0x164   :  { %v527_v33 = vadd.f32 %v525_v54, %v522_v55 }
 0x166   :  { %638 = vtanh.f32 %v527_v33 }
 0x170   :  { %v639_v51 = vpop.eup %638 }
 0x171   :  { %529 = vst.msk [vmem:[#allocation7] sm:$0x3] %vm149_vm0, %v639_v51 }
 0x172   :  { %695 = shalt.err (!%p692_p6)
}
 0x173   :  { %s696_s10 = scalar_lea.hbm %s938_s2, 32 }
 0x174   :  { %p697_p7 = scmp.ne.s32.totalorder %s938_s2, %s696_s10  ;;  %p700_p8 = scmp.lt.u32.totalorder %s696_s10, %s938_s2 }
 0x176   :  { %p702_p9 = pnand %p700_p8, %p697_p7 }
 0x178   :  { %705 = shalt.err (!%p702_p9)
}
 0x179   :  { %539 = dma.vmem_to_hbm [thread:$0]  %s537_s6, 32, %s938_s2, [#allocation4]  }
 0x17a   :  { %710 = dma.done.wait [#allocation4], 32  }
 0x17b   :  { %711 = vsyncadd [#allocation4], 4294967264 }
 0x17c   :  { %543 = vsyncpa [#allocation3], 1 }
 0x17d   :  { %544 = vsyncpa [#allocation6], 1 }
 0x17e   :  { %545 = vsyncpa [#allocation4], 1 }

</bundles_post_ra>
